<compile_context>
chip_gen: v6e
topology: v6e:2x2x1
jax: 0.10.0
libtpu: 0.0.40
codegen_flags: <defaults>
</compile_context>

<pallas_src>
import jax
import jax.numpy as jnp
from jax.experimental import pallas as pl
from jax.experimental.pallas import tpu as pltpu


def _backproject_kernel(invk_ref, depth_ref, out_ref):
    # invk_ref : SMEM (1, 4, 4)
    # depth_ref: VMEM (1, 1, th, tw)
    # out_ref  : VMEM (1, 4, th, tw)
    th = out_ref.shape[2]
    tw = out_ref.shape[3]

    d = depth_ref[0, 0]  # (th, tw)

    # Pixel coordinates generated on the VPU; matches meshgrid(indexing='xy'):
    #   x = column index (width axis), y = row index (height axis).
    row_base = pl.program_id(1) * th
    y = (jax.lax.broadcasted_iota(jnp.int32, (th, tw), 0) + row_base).astype(
        jnp.float32
    )
    x = jax.lax.broadcasted_iota(jnp.int32, (th, tw), 1).astype(jnp.float32)

    # cam_points[r] = depth * (K[r,0]*x + K[r,1]*y + K[r,2]*1)
    rows = []
    for r in range(3):
        k0 = invk_ref[0, r, 0]
        k1 = invk_ref[0, r, 1]
        k2 = invk_ref[0, r, 2]
        rows.append(d * (k0 * x + k1 * y + k2))
    rows.append(jnp.ones_like(d))  # homogeneous ones row

    # One dense (4, th, tw) store.
    out_ref[0] = jnp.stack(rows, axis=0)


def _pick_row_tile(height, width, target_elems):
    """Largest row-tile th such that th divides H, th is a multiple of 8 (or th==H),
    and th*W stays near the target block size."""
    if height * width <= target_elems:
        return height
    best = None
    th = 8
    while th <= height:
        if height % th == 0 and th * width <= target_elems:
            best = th
        th += 8
    if best is not None:
        return best
    # No multiple-of-8 divisor fits the budget: smallest valid tile, else full H.
    th = 8
    while th <= height:
        if height % th == 0:
            return th
        th += 8
    return height


def backproject_depth(depth, inv_K, height, width, target_block_elems=65536):
    B = depth.shape[0]
    H, W = height, width

    depth4 = depth.reshape(B, 1, H, W).astype(jnp.float32)
    inv_K = inv_K.astype(jnp.float32)

    th = _pick_row_tile(H, W, target_block_elems)
    grid = (B, H // th)

    out = pl.pallas_call(
        _backproject_kernel,
        out_shape=jax.ShapeDtypeStruct((B, 4, H, W), jnp.float32),
        grid_spec=pltpu.PrefetchScalarGridSpec(
            num_scalar_prefetch=0,
            grid=grid,
            in_specs=[
                pl.BlockSpec(
                    (1, 4, 4),
                    lambda b, i: (b, 0, 0),
                    memory_space=pltpu.MemorySpace.SMEM,
                ),
                pl.BlockSpec((1, 1, th, W), lambda b, i: (b, 0, i, 0)),
            ],
            out_specs=pl.BlockSpec((1, 4, th, W), lambda b, i: (b, 0, i, 0)),
        ),
        compiler_params=pltpu.CompilerParams(
            dimension_semantics=("parallel", "parallel")
        ),
    )(inv_K, depth4)

    # (B, 4, H, W) -> (B, 4, H*W): last two dims are contiguous, free reshape.
    return out.reshape(B, 4, H * W)


def _reference(depth, inv_K, height, width):
    B = depth.shape[0]
    HW = height * width
    xs, ys = jnp.meshgrid(
        jnp.arange(width, dtype=jnp.float32),
        jnp.arange(height, dtype=jnp.float32),
        indexing="xy",
    )
    pix = jnp.stack(
        [xs.reshape(-1), ys.reshape(-1), jnp.ones(HW, jnp.float32)], axis=0
    )
    pix = jnp.broadcast_to(pix[None], (B, 3, HW))
    cam = jnp.einsum("bij,bjn->bin", inv_K[:, :3, :3], pix)
    cam = depth.reshape(B, 1, HW) * cam
    ones = jnp.ones((B, 1, HW), jnp.float32)
    return jnp.concatenate([cam, ones], axis=1)


if __name__ == "__main__":
    B, H, W = 2, 16, 16
    key = jax.random.PRNGKey(0)
    k_d, k_k = jax.random.split(key)

    depth = jax.random.uniform(k_d, (B, 1, H, W), jnp.float32, 0.1, 10.0)

    # Deterministic synthetic inv_K: inverse-intrinsics-like 4x4 per batch.
    fx, fy, cx, cy = float(W), float(H), W / 2.0, H / 2.0
    inv_K_single = jnp.array(
        [
            [1.0 / fx, 0.0, -cx / fx, 0.0],
            [0.0, 1.0 / fy, -cy / fy, 0.0],
            [0.0, 0.0, 1.0, 0.0],
            [0.0, 0.0, 0.0, 1.0],
        ],
        jnp.float32,
    )
    jitter = 0.01 * jax.random.normal(k_k, (B, 4, 4), jnp.float32)
    inv_K = inv_K_single[None] + jitter

    ref = _reference(depth, inv_K, H, W)

    # Default config: single (H, W) block per batch element.
    out = backproject_depth(depth, inv_K, H, W)
    out = jax.block_until_ready(out)
    assert out.shape == (B, 4, H * W)
    assert jnp.allclose(out, ref, atol=1e-5, rtol=1e-5), "mismatch vs reference"

    # Smaller block budget to exercise the multi-row-tile path (program_id offset).
    out_tiled = backproject_depth(depth, inv_K, H, W, target_block_elems=128)
    out_tiled = jax.block_until_ready(out_tiled)
    assert jnp.allclose(out_tiled, ref, atol=1e-5, rtol=1e-5), "tiled mismatch"

    print("KERNEL_OK")
</pallas_src>

<mosaic_0001>
module attributes {stable_mosaic.version = 11 : i64} {
  func.func @_backproject_kernel(%arg0: i32, %arg1: i32, %arg2: memref<1x4x4xf32, #tpu.memory_space<smem>>, %arg3: memref<1x1x16x16xf32, #tpu.memory_space<vmem>>, %arg4: memref<1x4x16x16xf32, #tpu.memory_space<vmem>>) attributes {dimension_semantics = [#tpu.dimension_semantics<parallel>, #tpu.dimension_semantics<parallel>], iteration_bounds = array<i64: 2, 1>, scalar_prefetch = 0 : i64, scratch_operands = 0 : i64, tpu.core_type = #tpu.core_type<tc>, window_params = [{transform_indices = @transform_0, window_bounds = array<i64: 1, 4, 4>}, {transform_indices = @transform_1, window_bounds = array<i64: 1, 1, 16, 16>}, {transform_indices = @transform_2, window_bounds = array<i64: 1, 4, 16, 16>}]} {
    %c0 = arith.constant 0 : index
    %c0_0 = arith.constant 0 : index
    %c0_1 = arith.constant 0 : index
    %c0_2 = arith.constant 0 : index
    %0 = vector.load %arg3[%c0, %c0_0, %c0_1, %c0_2] : memref<1x1x16x16xf32, #tpu.memory_space<vmem>>, vector<1x1x16x16xf32>
    %1 = vector.shape_cast %0 : vector<1x1x16x16xf32> to vector<16x16xf32>
    %c16_i32 = arith.constant 16 : i32
    %2 = arith.muli %arg1, %c16_i32 : i32
    %3 = tpu.iota {dimensions = array<i32: 0>} : vector<16x16xi32>
    %4 = vector.broadcast %2 : i32 to vector<16x16xi32>
    %5 = arith.addi %3, %4 : vector<16x16xi32>
    %6 = arith.sitofp %5 : vector<16x16xi32> to vector<16x16xf32>
    %7 = tpu.iota {dimensions = array<i32: 1>} : vector<16x16xi32>
    %8 = arith.sitofp %7 : vector<16x16xi32> to vector<16x16xf32>
    %c0_3 = arith.constant 0 : index
    %c0_4 = arith.constant 0 : index
    %c0_5 = arith.constant 0 : index
    %9 = memref.load %arg2[%c0_3, %c0_4, %c0_5] : memref<1x4x4xf32, #tpu.memory_space<smem>>
    %c0_6 = arith.constant 0 : index
    %c0_7 = arith.constant 0 : index
    %c1 = arith.constant 1 : index
    %10 = memref.load %arg2[%c0_6, %c0_7, %c1] : memref<1x4x4xf32, #tpu.memory_space<smem>>
    %c0_8 = arith.constant 0 : index
    %c0_9 = arith.constant 0 : index
    %c2 = arith.constant 2 : index
    %11 = memref.load %arg2[%c0_8, %c0_9, %c2] : memref<1x4x4xf32, #tpu.memory_space<smem>>
    %12 = vector.broadcast %9 : f32 to vector<16x16xf32>
    %13 = arith.mulf %12, %8 : vector<16x16xf32>
    %14 = vector.broadcast %10 : f32 to vector<16x16xf32>
    %15 = arith.mulf %14, %6 : vector<16x16xf32>
    %16 = arith.addf %13, %15 : vector<16x16xf32>
    %17 = vector.broadcast %11 : f32 to vector<16x16xf32>
    %18 = arith.addf %16, %17 : vector<16x16xf32>
    %19 = arith.mulf %1, %18 : vector<16x16xf32>
    %c0_10 = arith.constant 0 : index
    %c1_11 = arith.constant 1 : index
    %c0_12 = arith.constant 0 : index
    %20 = memref.load %arg2[%c0_10, %c1_11, %c0_12] : memref<1x4x4xf32, #tpu.memory_space<smem>>
    %c0_13 = arith.constant 0 : index
    %c1_14 = arith.constant 1 : index
    %c1_15 = arith.constant 1 : index
    %21 = memref.load %arg2[%c0_13, %c1_14, %c1_15] : memref<1x4x4xf32, #tpu.memory_space<smem>>
    %c0_16 = arith.constant 0 : index
    %c1_17 = arith.constant 1 : index
    %c2_18 = arith.constant 2 : index
    %22 = memref.load %arg2[%c0_16, %c1_17, %c2_18] : memref<1x4x4xf32, #tpu.memory_space<smem>>
    %23 = vector.broadcast %20 : f32 to vector<16x16xf32>
    %24 = arith.mulf %23, %8 : vector<16x16xf32>
    %25 = vector.broadcast %21 : f32 to vector<16x16xf32>
    %26 = arith.mulf %25, %6 : vector<16x16xf32>
    %27 = arith.addf %24, %26 : vector<16x16xf32>
    %28 = vector.broadcast %22 : f32 to vector<16x16xf32>
    %29 = arith.addf %27, %28 : vector<16x16xf32>
    %30 = arith.mulf %1, %29 : vector<16x16xf32>
    %c0_19 = arith.constant 0 : index
    %c2_20 = arith.constant 2 : index
    %c0_21 = arith.constant 0 : index
    %31 = memref.load %arg2[%c0_19, %c2_20, %c0_21] : memref<1x4x4xf32, #tpu.memory_space<smem>>
    %c0_22 = arith.constant 0 : index
    %c2_23 = arith.constant 2 : index
    %c1_24 = arith.constant 1 : index
    %32 = memref.load %arg2[%c0_22, %c2_23, %c1_24] : memref<1x4x4xf32, #tpu.memory_space<smem>>
    %c0_25 = arith.constant 0 : index
    %c2_26 = arith.constant 2 : index
    %c2_27 = arith.constant 2 : index
    %33 = memref.load %arg2[%c0_25, %c2_26, %c2_27] : memref<1x4x4xf32, #tpu.memory_space<smem>>
    %34 = vector.broadcast %31 : f32 to vector<16x16xf32>
    %35 = arith.mulf %34, %8 : vector<16x16xf32>
    %36 = vector.broadcast %32 : f32 to vector<16x16xf32>
    %37 = arith.mulf %36, %6 : vector<16x16xf32>
    %38 = arith.addf %35, %37 : vector<16x16xf32>
    %39 = vector.broadcast %33 : f32 to vector<16x16xf32>
    %40 = arith.addf %38, %39 : vector<16x16xf32>
    %41 = arith.mulf %1, %40 : vector<16x16xf32>
    %cst = arith.constant 1.000000e+00 : f32
    %42 = vector.broadcast %cst : f32 to vector<16x16xf32>
    %43 = vector.shape_cast %19 : vector<16x16xf32> to vector<1x16x16xf32>
    %44 = vector.shape_cast %30 : vector<16x16xf32> to vector<1x16x16xf32>
    %45 = vector.shape_cast %41 : vector<16x16xf32> to vector<1x16x16xf32>
    %46 = vector.shape_cast %42 : vector<16x16xf32> to vector<1x16x16xf32>
    %47 = tpu.concatenate %43, %44, %45, %46 in 0 : vector<1x16x16xf32>, vector<1x16x16xf32>, vector<1x16x16xf32>, vector<1x16x16xf32> -> vector<4x16x16xf32>
    %c0_28 = arith.constant 0 : index
    %c0_29 = arith.constant 0 : index
    %c0_30 = arith.constant 0 : index
    %c0_31 = arith.constant 0 : index
    %48 = vector.load %arg4[%c0_28, %c0_29, %c0_30, %c0_31] : memref<1x4x16x16xf32, #tpu.memory_space<vmem>>, vector<1x4x16x16xf32>
    %49 = vector.shape_cast %48 : vector<1x4x16x16xf32> to vector<4x16x16xf32>
    %50 = vector.shape_cast %47 : vector<4x16x16xf32> to vector<1x4x16x16xf32>
    tpu.vector_store %arg4[%c0_28, %c0_29, %c0_30, %c0_31], %50 {strides = array<i32>} : memref<1x4x16x16xf32, #tpu.memory_space<vmem>>, vector<1x4x16x16xf32>,
    return
  }
  func.func @transform_0(%arg0: i32, %arg1: i32) -> (i32, i32, i32) {
    %c0_i32 = arith.constant 0 : i32
    %c0_i32_0 = arith.constant 0 : i32
    %c0_i32_1 = arith.constant 0 : i32
    return %arg0, %c0_i32, %c0_i32_0 : i32, i32, i32
  }
  func.func @transform_1(%arg0: i32, %arg1: i32) -> (i32, i32, i32, i32) {
    %c0_i32 = arith.constant 0 : i32
    %c0_i32_0 = arith.constant 0 : i32
    %c0_i32_1 = arith.constant 0 : i32
    return %arg0, %c0_i32, %arg1, %c0_i32_0 : i32, i32, i32, i32
  }
  func.func @transform_2(%arg0: i32, %arg1: i32) -> (i32, i32, i32, i32) {
    %c0_i32 = arith.constant 0 : i32
    %c0_i32_0 = arith.constant 0 : i32
    %c0_i32_1 = arith.constant 0 : i32
    return %arg0, %c0_i32, %arg1, %c0_i32_0 : i32, i32, i32, i32
  }
}

</mosaic_0001>

<bundles_post_ra>
// kernel: tpu_custom_call.1
= control target key start
LH: loop header
LB: loop body
LE: loop exit
PB: predicated region body
PF: predicated region fallthrough
CT: control target
= control target key end

     0   :  { %7 = vsyncpa [#allocation5], 0  ;;  %s882_s0 = inlined_call_operand.hbm [shape: f32[2,4,4], index: 0, kind: input, shape index: {}]   ;;  %s883_s1 = inlined_call_operand.hbm [shape: f32[2,1,16,16], index: 1, kind: input, shape index: {}]   ;;  %s884_s2 = inlined_call_operand.hbm [shape: f32[2,4,16,16], index: 2, kind: output, shape index: {}]  }
   0x1   :  { %9 = vsyncpa [#allocation5 + $0x1], 0 }
   0x2   :  { %10 = vsyncpa [#allocation3], 0 }
   0x3   :  { %12 = vsyncpa [#allocation3 + $0x1], 0 }
   0x4   :  { %13 = vsyncpa [#allocation4], 0 }
   0x5   :  { %15 = vsyncpa [#allocation4 + $0x1], 0  ;;  %s668_s9 = smov 0   ;;  %s670_s10 = smov 0  }
   0x6   :  { %s672_s11 = smov 0   ;;  %s674_s12 = smov 0  }
   0x7   :  { %s676_s13 = smov 0   ;;  %s678_s14 = smov 0  }
   0x8 LB: > { %s412_s15 = sadd.s32 4294967295, %s637_s14   ;;  %s413_s16 = sadd.s32 4294967294, %s637_s14   ;;  %s637_s14 = sphi %s678_s14, %s21_s14   ;;  %s633_s13 = sphi %s676_s13, %s895_s13   ;;  %s629_s12 = sphi %s674_s12, %s894_s12   ;;  %s625_s11 = sphi %s672_s11, %s893_s11   ;;  %s621_s10 = sphi %s670_s10, %s892_s10   ;;  %s617_s9 = sphi %s668_s9, %s891_s9  }
   0x9   : > { %s33_s17 = sadd.s32 1, %s633_s13  ;;  %s40_s18 = sadd.s32 1, %s625_s11 }
   0xa   : > { %p35_p0 = scmp.ge.s32.totalorder %s33_s17, 2  ;;  %p47_p1 = scmp.ne.s32.totalorder %s625_s11, %s621_s10 }
   0xb   : > { %p48_p2 = scmp.eq.s32.totalorder %s637_s14, 0  ;;  %p53_p3 = scmp.ne.s32.totalorder %s621_s10, %s617_s9 }
   0xc   : > { %s897_s17 = smov (%p35_p0, %s33_s17), 0  ;;  %p54_p5 = scmp.eq.s32.totalorder %s412_s15, 0 }
   0xd   : > { %p709_p4 = por %p48_p2, %p47_p1  ;;  %s37_s20 = ssub.s32 %s633_s13, %s897_s17 }
   0xe   : > { %p107_p6 = scmp.eq.s32.totalorder %s412_s15, 1  ;;  %p38_p7 = scmp.eq.s32.totalorder %s37_s20, 0 }
   0xf   : > { %p715_p8 = por %p54_p5, %p53_p3  ;;  %p113_p10 = scmp.eq.s32.totalorder %s413_s16, 1 }
  0x10   : > { %p719_p9 = por %p107_p6, %p47_p1  ;;  %p415_p12 = scmp.ge.s32.totalorder %s637_s14, 2 }
  0x11   : > { %s724_s23 = scalar_select %p38_p7, %s625_s11, %s40_s18  }
  0x12   : > { %p726_p11 = por %p113_p10, %p53_p3  ;;  %p450_p13 = scmp.lt.s32.totalorder %s637_s14, 2 }
  0x13   : > { %s733_s25 = sand.u32 1, %s625_s11   ;;  %s417_s27 = sshll.u32 %s633_s13, 6 }
  0x14   : > { %s416_s26 = sshll.u32 %s733_s25, 9  ;;  %s142_s30 = scalar_lea.hbm %s882_s0, %s417_s27 }
  0x15   : > { %p742_p0 = pnand %p450_p13, %p709_p4  ;;  %p421_p1 = scmp.ge.s32.totalorder %s637_s14, 1 }
  0x16   : > { %p170_p2 = scmp.lt.s32.totalorder %s637_s14, 3  ;;  %s137_s4 = scalar_lea.smem [#allocation2], %s416_s26 }
  0x17   : > { %s134_s5 = scalar_lea.sflag [#allocation5], %s733_s25  ;;  %s418_s7 = sshll.u32 %s733_s25, 4 }
  0x18   : > { %442 = dma.hbm_to_smem (!%p742_p0), %s142_s30, 64, %s137_s4, %s134_s5  }
  0x19   : > { %p751_p3 = pnand %p421_p1, %p170_p2  ;;  %s431_s8 = sshll.u32 %s633_s13, 8 }
  0x1a   : > { %s161_s18 = scalar_lea.hbm %s883_s1, %s431_s8  ;;  %s153_s19 = scalar_lea.vmem [#allocation6], %s418_s7 }
  0x1b   : > { %s162_s20 = sshll.u32 %s153_s19, 4  ;;  %s150_s27 = scalar_lea.sflag [#allocation3], %s733_s25  ;;  %s163_s20 = int_to_ptr.vmem [resolvable:$true] %s162_s20 }
  0x1c   : > { %p527_p4 = pneg %p742_p0  ;;  %s538_s26 = scalar_lea.vmem %s163_s20, 256 }
  0x1d   : > { %p539_p5 = scmp.ne.s32.totalorder %s163_s20, %s538_s26  ;;  %s639_s28 = smov [#allocation6]  }
  0x1e   : > { %s543_s29 = sshll.u32 %s639_s28, 4  ;;  %s544_s29 = int_to_ptr.vmem [resolvable:$false] %s543_s29 }
  0x1f   : > { %p541_p6 = pnand %p539_p5, %p527_p4  ;;  %s545_s30 = scalar_lea.vmem %s544_s29, 512 }
  0x20   : > { %p546_p10 = scmp.lt.s32.totalorder %s163_s20, %s544_s29  ;;  %p547_p13 = scmp.lt.s32.totalorder %s545_s30, %s538_s26 }
  0x21   : > { %p542_p7 = pneg %p541_p6 }
  0x22   : > { %p548_p1 = por %p547_p13, %p546_p10 }
  0x24   : > { %p549_p2 = pnand %p548_p1, %p542_p7 }
  0x26   : > { %552 = shalt.err (!%p549_p2)
}
  0x27   : > { %s640_s4 = smov 128   ;;  %s641_s5 = smov 8  }
  0x28   : > { %445 = dma.hbm_to_vmem [thread:$0]  (!%p742_p0), %s161_s18, 256, %s163_s20, %s150_s27, %s640_s4, %s640_s4, %s641_s5  }
  0x29   : > { %174 = sbr.rel (%p751_p3) target bundleno = 89 (0x59), region = 28  ;;  %s768_s25 = sand.u32 (!%p751_p3), 1, %s621_s10  }
  0x2a   : > { %s422_s7 = sshll.u32 (!%p751_p3), %s768_s25, 9  ;;  %s177_s8 = scalar_lea.sflag (!%p751_p3), [#allocation5], %s768_s25 }
  0x2b   : > { %s772_s15 = scalar_lea.smem (!%p751_p3), [#allocation2], %s422_s7 }
  0x2e   : > { %604 = dma.done.wait (%p715_p8), %s177_s8, 64  }
  0x2f   : > { %606 = vsyncadd (%p715_p8), %s177_s8, 4294967232  ;;  %s423_s3 = sshll.u32 %s768_s25, 4  ;;  %s186_s6 = scalar_lea.sflag [#allocation3], %s768_s25 }
  0x30   : > { %s780_s16 = scalar_lea.vmem [#allocation6], %s423_s3 }
  0x31   : > { %608 = dma.done.wait (%p715_p8), %s186_s6, 256  }
  0x32   : > { %610 = vsyncadd (%p715_p8), %s186_s6, 4294967040 }
  0x33   : > { %194 = sfence }
  0x34   : > { %s424_s18 = sshll.u32 %s768_s25, 6  ;;  %v221_v0 = vlaneseq  ;;  %s425_s19 = sld [smem:[#allocation2 + %s422_s7]]  ;;  %vm277_vm0 = vcmask 130048   ;;  %v643_v3 = vmov 1.0   ;;  %v218_v17 = vld [vmem:[%s780_s16] sm:$0xff]  ;;  %v219_v18 = vld [vmem:[%s780_s16 + $0x8] sm:$0xff] }
  0x35   : > { %s642_s20 = smov 1   ;;  %s788_s26 = scalar_lea.vmem [#allocation7], %s424_s18 }
  0x36   : > { %v222_v1 = vshrl.u32 %v221_v0, 7  ;;  %v230_v2 = vand.u32 127, %v221_v0  ;;  %s233_s27 = sld [smem:[%s772_s15 + %s642_s20]]  ;;  %284 = vst.msk [vmem:[%s788_s26 + $0x30] sm:$0xff] %vm277_vm0, %v643_v3  ;;  %285 = vst.msk [vmem:[%s788_s26 + $0x38] sm:$0xff] %vm277_vm0, %v643_v3  ;;  %s644_s21 = smov 2  }
  0x37   : > { %s795_s28 = sld [smem:[%s772_s15 + %s644_s21]]  ;;  %s645_s29 = smov 128  }
  0x38   : > { %v231_v4 = vcvt.s32.f32 %v230_v2  ;;  %v223_v5 = vadd.s32 8, %v222_v1  ;;  %v227_v6 = vcvt.s32.f32 %v222_v1  ;;  %s247_s30 = sld [smem:[%s772_s15 + %s645_s29]]  ;;  %s646_s4 = smov 129  }
  0x39   : > { %s248_s5 = sld [smem:[%s772_s15 + %s646_s4]]  ;;  %s647_s7 = smov 130  }
  0x3a   : > { %v235_v7 = vstv %s425_s19  ;;  %v228_v8 = vcvt.s32.f32 %v223_v5  ;;  %s801_s8 = sld [smem:[%s772_s15 + %s647_s7]]  ;;  %s648_s3 = smov 256  }
  0x3b   : > { %v236_v9 = vmul.f32 %v235_v7, %v231_v4  ;;  %s262_s6 = sld [smem:[%s772_s15 + %s648_s3]]  ;;  %s649_s18 = smov 257  }
  0x3c   : > { %v237_v10 = vstv %s233_s27  ;;  %s263_s20 = sld [smem:[%s772_s15 + %s649_s18]]  ;;  %s650_s19 = smov 258  }
  0x3d   : > { %v238_v11 = vmul.f32 %v237_v10, %v227_v6  ;;  %v239_v12 = vmul.f32 %v237_v10, %v228_v8  ;;  %v242_v13 = vstv %s795_s28  ;;  %s807_s21 = sld [smem:[%s772_s15 + %s650_s19]]  ;;  %s302_s15 = sshll.u32 %s788_s26, 4  ;;  %s821_s15 = int_to_ptr.vmem [resolvable:$true] %s302_s15 }
  0x3e   : > { %v250_v16 = vstv %s247_s30  ;;  %s432_s16 = sshll.u32 %s629_s12, 10  ;;  %s287_s12 = scalar_lea.sflag [#allocation4], %s768_s25 }
  0x3f   : > { %v240_v14 = vadd.f32 %v238_v11, %v236_v9  ;;  %v241_v15 = vadd.f32 %v239_v12, %v236_v9  ;;  %v251_v19 = vmul.f32 %v250_v16, %v231_v4  ;;  %v252_v20 = vstv %s248_s5  ;;  %s828_s30 = scalar_lea.hbm %s884_s2, %s432_s16  ;;  %s553_s4 = scalar_lea.vmem %s821_s15, 1024 }
  0x40   : > { %v253_v23 = vmul.f32 %v252_v20, %v227_v6  ;;  %v257_v24 = vstv %s801_s8  ;;  %v254_v25 = vmul.f32 %v252_v20, %v228_v8  ;;  %p554_p8 = scmp.ne.s32.totalorder %s821_s15, %s553_s4  ;;  %s651_s5 = smov [#allocation7]  }
  0x41   : > { %v243_v21 = vadd.f32 %v242_v13, %v240_v14  ;;  %v244_v22 = vadd.f32 %v242_v13, %v241_v15  ;;  %v265_v26 = vstv %s262_s6  ;;  %s557_s7 = sshll.u32 %s651_s5, 4  ;;  %s558_s7 = int_to_ptr.vmem [resolvable:$false] %s557_s7 }
  0x42   : > { %v255_v29 = vadd.f32 %v253_v23, %v251_v19  ;;  %v266_v30 = vmul.f32 %v265_v26, %v231_v4  ;;  %v256_v31 = vadd.f32 %v254_v25, %v251_v19  ;;  %v267_v32 = vstv %s263_s20  ;;  %p555_p0 = pnand %p554_p8, %p719_p9  ;;  %s559_s8 = scalar_lea.vmem %s558_s7, 2048 }
  0x43   : > { %v245_v27 = vmul.f32 %v243_v21, %v218_v17  ;;  %v246_v28 = vmul.f32 %v244_v22, %v219_v18  ;;  %v268_v34 = vmul.f32 %v267_v32, %v227_v6  ;;  %v269_v35 = vmul.f32 %v267_v32, %v228_v8  ;;  %p560_p4 = scmp.lt.s32.totalorder %s821_s15, %s558_s7  ;;  %p561_p5 = scmp.lt.s32.totalorder %s559_s8, %s553_s4 }
  0x44   : > { %v258_v33 = vadd.f32 %v257_v24, %v255_v29  ;;  %v259_v36 = vadd.f32 %v257_v24, %v256_v31  ;;  %v272_v37 = vstv %s807_s21  ;;  %p556_p3 = pneg %p555_p0 }
  0x45   : > { %278 = vst.msk [vmem:[%s788_s26] sm:$0xff] %vm277_vm0, %v245_v27  ;;  %279 = vst.msk [vmem:[%s788_s26 + $0x8] sm:$0xff] %vm277_vm0, %v246_v28  ;;  %v270_v39 = vadd.f32 %v268_v34, %v266_v30  ;;  %v271_v40 = vadd.f32 %v269_v35, %v266_v30  ;;  %p562_p6 = por %p561_p5, %p560_p4 }
  0x46   : > { %v260_v38 = vmul.f32 %v258_v33, %v218_v17  ;;  %v261_v41 = vmul.f32 %v259_v36, %v219_v18 }
  0x47   : > { %v273_v42 = vadd.f32 %v272_v37, %v270_v39  ;;  %v274_v43 = vadd.f32 %v272_v37, %v271_v40  ;;  %p563_p7 = pnand %p562_p6, %p556_p3 }
  0x48   : > { %280 = vst.msk [vmem:[%s788_s26 + $0x10] sm:$0xff] %vm277_vm0, %v260_v38  ;;  %281 = vst.msk [vmem:[%s788_s26 + $0x18] sm:$0xff] %vm277_vm0, %v261_v41 }
  0x49   : > { %v275_v44 = vmul.f32 %v273_v42, %v218_v17  ;;  %v276_v45 = vmul.f32 %v274_v43, %v219_v18 }
  0x4b   : > { %282 = vst.msk [vmem:[%s788_s26 + $0x20] sm:$0xff] %vm277_vm0, %v275_v44  ;;  %283 = vst.msk [vmem:[%s788_s26 + $0x28] sm:$0xff] %vm277_vm0, %v276_v45 }
  0x4c   : > { %566 = shalt.err (!%p563_p7)
}
  0x4d   : > { %s567_s26 = scalar_lea.hbm %s828_s30, 1024  ;;  %s571_s18 = scalar_lea.hbm %s884_s2, 2048 }
  0x4e   : > { %p568_p10 = scmp.ne.s32.totalorder %s828_s30, %s567_s26  ;;  %p572_p2 = scmp.lt.s32.totalorder %s828_s30, %s884_s2 }
  0x4f   : > { %p573_p8 = scmp.lt.s32.totalorder %s571_s18, %s567_s26 }
  0x50   : > { %p569_p13 = pnand %p568_p10, %p719_p9 }
  0x51   : > { %p574_p0 = por %p573_p8, %p572_p2 }
  0x52   : > { %p570_p1 = pneg %p569_p13 }
  0x54   : > { %p575_p3 = pnand %p574_p0, %p570_p1 }
  0x56   : > { %578 = shalt.err (!%p575_p3)
}
  0x57   : > { %s652_s21 = smov 8  }
  0x58   : > { %437 = dma.vmem_to_hbm [thread:$0]  (%p719_p9), %s821_s15, 1024, %s828_s30, %s287_s12, %s645_s29, %s645_s29, %s652_s21  }
  0x59 PF: > { %s317_s16 = sand.u32 1, %s617_s9   ;;  %p447_p4 = pnand %p415_p12, %p726_p11 }
  0x5a   : > { %s318_s27 = scalar_lea.sflag [#allocation4], %s317_s16 }
  0x5b   : > { %p448_p5 = pneg %p447_p4 }
  0x5d   : > { %612 = dma.done.wait (%p448_p5), %s318_s27, 1024  }
  0x5e   : > { %614 = vsyncadd (%p448_p5), %s318_s27, 4294966272  ;;  %s21_s14 = sadd.s32 1, %s637_s14   ;;  %s891_s9 = smov %s621_s10 }
  0x5f   : > { %p18_p6 = scmp.ge.s32.totalorder %s21_s14, 4   ;;  %s892_s10 = smov %s625_s11 }
  0x60   : > { %s893_s11 = smov %s724_s23  ;;  %s894_s12 = smov %s633_s13 }
  0x61   : > { %s895_s13 = smov %s897_s17  ;;  %20 = sbr.rel (!%p18_p6) target bundleno = 8 (0x8), region = 86 }
  0x66   :  { %323 = vsyncpa [#allocation3], 1 }
  0x67   :  { %325 = vsyncpa [#allocation3 + $0x1], 1 }
  0x68   :  { %326 = vsyncpa [#allocation4], 1 }
  0x69   :  { %328 = vsyncpa [#allocation4 + $0x1], 1 }
  0x6a   :  { %329 = vsyncpa [#allocation5], 1 }
  0x6b   :  { %331 = vsyncpa [#allocation5 + $0x1], 1 }

</bundles_post_ra>
